<compile_context>
chip_gen: v6e
topology: v6e:2x2x1
jax: 0.10.0
libtpu: 0.0.40
codegen_flags: <defaults>
</compile_context>

<pallas_src>
import functools

import jax
import jax.numpy as jnp
from jax import lax
from jax.experimental import pallas as pl
from jax.experimental.pallas import tpu as pltpu


LANE_CHUNK = 512   # inner-loop chunk (lanes): keeps (12, LC) hidden act in vregs


def _cdiv(a, b):
    return (a + b - 1) // b


def _round_up(x, m):
    return ((x + m - 1) // m) * m


def mlp_kernel(xt_ref, w1t_ref, b1_ref, w2t_ref, b2_ref, o_ref, *, lane_chunk, n_chunks):
    """One batch tile, batch on the lane axis.

    xt_ref : (in_f, TB)  bf16  activations (batch on lanes)
    w1t_ref: (hid, in_f) bf16  fc3 weight (transposed)
    b1_ref : (hid, 1)    f32
    w2t_ref: (out, hid)  bf16  fc6 weight (transposed)
    b2_ref : (out, 1)    f32
    o_ref  : (out, TB)   f32
    """
    hid, _ = w1t_ref.shape
    out_f = w2t_ref.shape[0]

    # Tiny weights -> vregs once per tile.
    w1t = w1t_ref[...]
    w2t = w2t_ref[...]
    # Hoist bias broadcasts out of the inner loop (JAX doesn't CSE broadcast_in_dim).
    b1 = jnp.broadcast_to(b1_ref[...], (hid, lane_chunk))
    b2 = jnp.broadcast_to(b2_ref[...], (out_f, lane_chunk))

    def body(j, carry):
        start = pl.multiple_of(j * lane_chunk, lane_chunk)
        x_c = xt_ref[:, pl.ds(start, lane_chunk)]                       # (in_f, LC) bf16
        h = jnp.dot(w1t, x_c, preferred_element_type=jnp.float32)       # MXU, f32 acc
        h = jnp.maximum(h + b1, 0.0)                                    # VPU, stays in vregs
        y = jnp.dot(w2t, h.astype(jnp.bfloat16),
                    preferred_element_type=jnp.float32)                 # MXU, f32 acc
        o_ref[:, pl.ds(start, lane_chunk)] = (y + b2).astype(o_ref.dtype)
        return carry

    lax.fori_loop(0, n_chunks, body, None,
                  unroll=True if n_chunks <= 8 else 4)


def net_forward_lanes(xt, w1, b1, w2, b2, *, max_tb=65536, out_dtype=jnp.float32):
    """Lane-major entry point (no extra HBM passes): xt is (in_f, B); returns (out_f, B).

    Weights are stored transposed vs. nn.Linear, i.e. y = x @ W + b:
      w1: (in_f, hid), b1: (1, hid), w2: (hid, out_f), b2: (1, out_f).
    """
    in_f, B = xt.shape
    hid = w1.shape[1]
    out_f = w2.shape[1]

    # Grid first, then tile size -> padding bounded by < LANE_CHUNK per tile.
    grid = max(1, _cdiv(B, max_tb))
    tb = _round_up(_cdiv(B, grid), LANE_CHUNK)
    b_pad = grid * tb

    xt = xt.astype(jnp.bfloat16)          # bf16 on the wire: halves input HBM traffic
    if b_pad != B:
        xt = jnp.pad(xt, ((0, 0), (0, b_pad - B)))

    # Small grid-resident operands (bf16 weights for the MXU, f32 biases).
    w1t = w1.T.astype(jnp.bfloat16)                       # (hid, in_f)
    w2t = w2.T.astype(jnp.bfloat16)                       # (out, hid)
    b1c = jnp.asarray(b1, jnp.float32).reshape(hid, 1)
    b2c = jnp.asarray(b2, jnp.float32).reshape(out_f, 1)

    out_bytes = jnp.dtype(out_dtype).itemsize
    cost = pl.CostEstimate(
        flops=2 * B * (in_f * hid + hid * out_f),
        bytes_accessed=(B * in_f * 2 + B * out_f * out_bytes
                        + 2 * (in_f * hid + hid * out_f) + 4 * (hid + out_f)),
        transcendentals=0,
    )

    kernel = functools.partial(mlp_kernel,
                               lane_chunk=LANE_CHUNK,
                               n_chunks=tb // LANE_CHUNK)

    out_t = pl.pallas_call(
        kernel,
        out_shape=jax.ShapeDtypeStruct((out_f, b_pad), out_dtype),
        grid=(grid,),
        in_specs=[
            pl.BlockSpec((in_f, tb), lambda i: (0, i)),    # stream batch tiles
            pl.BlockSpec((hid, in_f), lambda i: (0, 0)),   # weights stay resident in VMEM
            pl.BlockSpec((hid, 1), lambda i: (0, 0)),
            pl.BlockSpec((out_f, hid), lambda i: (0, 0)),
            pl.BlockSpec((out_f, 1), lambda i: (0, 0)),
        ],
        out_specs=pl.BlockSpec((out_f, tb), lambda i: (0, i)),
        compiler_params=pltpu.CompilerParams(
            dimension_semantics=("parallel",),   # batch tiles split across TCs (v7x megacore)
        ),
        cost_estimate=cost,
    )(xt, w1t, b1c, w2t, b2c)

    return out_t if b_pad == B else out_t[:, :B]


def net_forward(x, w1, b1, w2, b2, *, max_tb=65536, out_dtype=jnp.float32):
    """nn.Module-compatible layout: x (B, in_f) -> (B, out_f).

    The transpose+bf16 cast is one fused XLA pass; callers that can provide
    activations already laid out as (in_f, B) bf16 should call net_forward_lanes
    directly and skip both transposes entirely.
    """
    xt = jnp.transpose(x).astype(jnp.bfloat16)
    out_t = net_forward_lanes(xt, w1, b1, w2, b2, max_tb=max_tb, out_dtype=out_dtype)
    return jnp.transpose(out_t)


def init_params(key):
    """Deterministic init mimicking nn.Linear: U(-1/sqrt(fan_in), 1/sqrt(fan_in))."""
    k1, k2, k3, k4 = jax.random.split(key, 4)
    bound1 = 1.0 / jnp.sqrt(4.0)
    w1 = jax.random.uniform(k1, (4, 12), jnp.float32, -bound1, bound1)
    b1 = jax.random.uniform(k2, (1, 12), jnp.float32, -bound1, bound1)
    bound2 = 1.0 / jnp.sqrt(12.0)
    w2 = jax.random.uniform(k3, (12, 3), jnp.float32, -bound2, bound2)
    b2 = jax.random.uniform(k4, (1, 3), jnp.float32, -bound2, bound2)
    return w1, b1, w2, b2


def ref_forward_f32(x, w1, b1, w2, b2):
    return jnp.maximum(x @ w1 + b1, 0.0) @ w2 + b2


def ref_forward_bf16(x, w1, b1, w2, b2):
    """Same bf16-operand / f32-accumulate quantization as the kernel's MXU path."""
    f32 = jnp.float32
    q = lambda a: a.astype(jnp.bfloat16).astype(f32)
    h = jnp.maximum(q(x) @ q(w1) + b1, 0.0)
    return q(h) @ q(w2) + b2


if __name__ == "__main__":
    key = jax.random.PRNGKey(0)
    kx, kx2, kp = jax.random.split(key, 3)

    w1, b1, w2, b2 = init_params(kp)

    # batch=8, in_features=4 (as implied by Linear(4, 12))
    x = jax.random.normal(kx, (8, 4), jnp.float32)
    out = net_forward(x, w1, b1, w2, b2)
    jax.block_until_ready(out)
    assert out.shape == (8, 3)
    # Bit-level match against a reference using the same bf16-operand quantization.
    assert jnp.allclose(out, ref_forward_bf16(x, w1, b1, w2, b2), atol=5e-3, rtol=5e-3)
    # Loose sanity check against the pure-f32 module math.
    assert jnp.allclose(out, ref_forward_f32(x, w1, b1, w2, b2), atol=1e-1, rtol=1e-1)

    # Exercise the multi-tile grid + bounded-padding path (still a small problem).
    x2 = jax.random.normal(kx2, (1500, 4), jnp.float32)
    out2 = net_forward(x2, w1, b1, w2, b2, max_tb=512)
    jax.block_until_ready(out2)
    assert out2.shape == (1500, 3)
    assert jnp.allclose(out2, ref_forward_bf16(x2, w1, b1, w2, b2), atol=5e-3, rtol=5e-3)

    print("KERNEL_OK")
</pallas_src>

<mosaic_0001>
module attributes {stable_mosaic.version = 11 : i64} {
  func.func @mlp_kernel(%arg0: i32, %arg1: memref<4x512xbf16, #tpu.memory_space<vmem>>, %arg2: memref<12x4xbf16, #tpu.memory_space<vmem>>, %arg3: memref<12x1xf32, #tpu.memory_space<vmem>>, %arg4: memref<3x12xbf16, #tpu.memory_space<vmem>>, %arg5: memref<3x1xf32, #tpu.memory_space<vmem>>, %arg6: memref<3x512xf32, #tpu.memory_space<vmem>>) attributes {dimension_semantics = [#tpu.dimension_semantics<parallel>], iteration_bounds = array<i64: 1>, scalar_prefetch = 0 : i64, scratch_operands = 0 : i64, tpu.core_type = #tpu.core_type<tc>, window_params = [{transform_indices = @transform_0, window_bounds = array<i64: 4, 512>}, {pipeline_mode = #tpu.pipeline_mode<synchronous>, transform_indices = @transform_1, window_bounds = array<i64: 12, 4>}, {pipeline_mode = #tpu.pipeline_mode<synchronous>, transform_indices = @transform_2, window_bounds = array<i64: 12, 1>}, {pipeline_mode = #tpu.pipeline_mode<synchronous>, transform_indices = @transform_3, window_bounds = array<i64: 3, 12>}, {pipeline_mode = #tpu.pipeline_mode<synchronous>, transform_indices = @transform_4, window_bounds = array<i64: 3, 1>}, {transform_indices = @transform_5, window_bounds = array<i64: 3, 512>}]} {
    %c0 = arith.constant 0 : index
    %c0_0 = arith.constant 0 : index
    %0 = vector.load %arg2[%c0, %c0_0] : memref<12x4xbf16, #tpu.memory_space<vmem>>, vector<12x4xbf16>
    %c0_1 = arith.constant 0 : index
    %c0_2 = arith.constant 0 : index
    %1 = vector.load %arg4[%c0_1, %c0_2] : memref<3x12xbf16, #tpu.memory_space<vmem>>, vector<3x12xbf16>
    %c0_3 = arith.constant 0 : index
    %c0_4 = arith.constant 0 : index
    %2 = vector.load %arg3[%c0_3, %c0_4] : memref<12x1xf32, #tpu.memory_space<vmem>>, vector<12x1xf32>
    %3 = vector.shape_cast %2 : vector<12x1xf32> to vector<12x1xf32>
    %4 = vector.broadcast %3 : vector<12x1xf32> to vector<12x512xf32>
    %c0_5 = arith.constant 0 : index
    %c0_6 = arith.constant 0 : index
    %5 = vector.load %arg5[%c0_5, %c0_6] : memref<3x1xf32, #tpu.memory_space<vmem>>, vector<3x1xf32>
    %6 = vector.shape_cast %5 : vector<3x1xf32> to vector<3x1xf32>
    %7 = vector.broadcast %6 : vector<3x1xf32> to vector<3x512xf32>
    %c0_i32 = arith.constant 0 : i32
    %c512_i32 = arith.constant 512 : i32
    %8 = arith.muli %c0_i32, %c512_i32 : i32
    %9 = tpu.assume_multiple %8, 512 : i32
    %c0_7 = arith.constant 0 : index
    %10 = arith.index_cast %9 : i32 to index
    %11 = vector.load %arg1[%c0_7, %10] : memref<4x512xbf16, #tpu.memory_space<vmem>>, vector<4x512xbf16>
    %cst = arith.constant dense<0.000000e+00> : vector<12x512xf32>
    %12 = tpu.matmul %0, %11, %cst {dimension_numbers = #tpu.dot_dimension_numbers<[1], [0], [0], [1], [0, 0, 1, 1], [], []>} : vector<12x4xbf16>, vector<4x512xbf16>, vector<12x512xf32> -> vector<12x512xf32>
    %13 = arith.addf %12, %4 : vector<12x512xf32>
    %cst_8 = arith.constant 0.000000e+00 : f32
    %14 = vector.broadcast %cst_8 : f32 to vector<12x512xf32>
    %15 = arith.maximumf %13, %14 : vector<12x512xf32>
    %16 = arith.truncf %15 : vector<12x512xf32> to vector<12x512xbf16>
    %cst_9 = arith.constant dense<0.000000e+00> : vector<3x512xf32>
    %17 = tpu.matmul %1, %16, %cst_9 {dimension_numbers = #tpu.dot_dimension_numbers<[1], [0], [0], [1], [0, 0, 1, 1], [], []>} : vector<3x12xbf16>, vector<12x512xbf16>, vector<3x512xf32> -> vector<3x512xf32>
    %18 = arith.addf %17, %7 : vector<3x512xf32>
    %c0_10 = arith.constant 0 : index
    %19 = arith.index_cast %9 : i32 to index
    %20 = vector.load %arg6[%c0_10, %19] : memref<3x512xf32, #tpu.memory_space<vmem>>, vector<3x512xf32>
    tpu.vector_store %arg6[%c0_10, %19], %18 {strides = array<i32>} : memref<3x512xf32, #tpu.memory_space<vmem>>, vector<3x512xf32>,
    %c1_i32 = arith.constant 1 : i32
    return
  }
  func.func @transform_0(%arg0: i32) -> (i32, i32) {
    %c0_i32 = arith.constant 0 : i32
    %c0_i32_0 = arith.constant 0 : i32
    return %c0_i32, %arg0 : i32, i32
  }
  func.func @transform_1(%arg0: i32) -> (i32, i32) {
    %c0_i32 = arith.constant 0 : i32
    %c0_i32_0 = arith.constant 0 : i32
    %c0_i32_1 = arith.constant 0 : i32
    return %c0_i32, %c0_i32_0 : i32, i32
  }
  func.func @transform_2(%arg0: i32) -> (i32, i32) {
    %c0_i32 = arith.constant 0 : i32
    %c0_i32_0 = arith.constant 0 : i32
    %c0_i32_1 = arith.constant 0 : i32
    return %c0_i32, %c0_i32_0 : i32, i32
  }
  func.func @transform_3(%arg0: i32) -> (i32, i32) {
    %c0_i32 = arith.constant 0 : i32
    %c0_i32_0 = arith.constant 0 : i32
    %c0_i32_1 = arith.constant 0 : i32
    return %c0_i32, %c0_i32_0 : i32, i32
  }
  func.func @transform_4(%arg0: i32) -> (i32, i32) {
    %c0_i32 = arith.constant 0 : i32
    %c0_i32_0 = arith.constant 0 : i32
    %c0_i32_1 = arith.constant 0 : i32
    return %c0_i32, %c0_i32_0 : i32, i32
  }
  func.func @transform_5(%arg0: i32) -> (i32, i32) {
    %c0_i32 = arith.constant 0 : i32
    %c0_i32_0 = arith.constant 0 : i32
    return %c0_i32, %arg0 : i32, i32
  }
}

</mosaic_0001>

<bundles_post_ra>
// kernel: tpu_custom_call.1
= control target key start
LH: loop header
LB: loop body
LE: loop exit
PB: predicated region body
PF: predicated region fallthrough
CT: control target
= control target key end

     0   :  { %v54_v1 = vlaneseq  ;;  %v343_v3 = vmov 1983009808   ;;  %v344_v5 = vmov 0   ;;  %s397_s0 = inlined_call_operand.vmem [shape: bf16[4,512], index: 0, kind: input, shape index: {}]   ;;  %s398_s1 = inlined_call_operand.vmem [shape: bf16[12,4], index: 1, kind: input, shape index: {}]   ;;  %s399_s2 = inlined_call_operand.vmem [shape: f32[12,1], index: 2, kind: input, shape index: {}]   ;;  %s400_s3 = inlined_call_operand.vmem [shape: bf16[3,12], index: 3, kind: input, shape index: {}]   ;;  %s401_s4 = inlined_call_operand.vmem [shape: f32[3,1], index: 4, kind: input, shape index: {}]   ;;  %s402_s5 = inlined_call_operand.hbm [shape: f32[3,512], index: 5, kind: output, shape index: {}]  }
   0x1   :  { %v43_v0 = vld [vmem:[%s397_s0] sm:$0xff]  ;;  %v52_v4 = vunpack.c.l.s4 %v343_v3  ;;  %116 = vmatprep.mubr.bf16.mxu0 %v344_v5  ;;  %159 = vmatprep.mubr.bf16.mxu1 %v344_v5 }
   0x2   :  { %v25_v2 = vld [vmem:[%s399_s2] sm:$0xff]  ;;  %v55_v6 = vshrl.u32 %v54_v1, 7  ;;  %317 = vset.pattern.permute.xlu0 %v344_v5  ;;  %318 = vset.pattern.permute.xlu1 %v344_v5 }
   0x3   :  { %10 = vsyncpa [#allocation3], 0  ;;  %v53_v7 = vunpack.c.0.s8 %v52_v4  ;;  %v50_v8 = vcombine.high %v43_v0, %v43_v0  ;;  %29 = vperm.xlu0 %317, %v25_v2   ;;  %v26_v9 = vld [vmem:[%s399_s2 + $0x8] sm:$0xf]  ;;  %vm71_vm0 = vcmask 1041408   ;;  %vm67_vm1 = vcmask 31744  }
   0x4   :  { %v320_v17 = vld [vmem:[%s398_s1] sm:$0x3f]   ;;  %vm186_vm2 = vcmask 1045504   ;;  %vm182_vm3 = vcmask 97280   ;;  %s345_s26 = smov [#allocation2]  }
   0x5   :  { %v56_v10 = vsub.s32 %v53_v7, %v55_v6  ;;  %v37_v18 = vld [vmem:[%s401_s4] sm:$0x7]  ;;  %s297_s27 = sshll.u32 %s345_s26, 4  ;;  %s298_s27 = int_to_ptr.vmem [resolvable:$true] %s297_s27 }
   0x6   :  { %40 = vperm.xlu1 %318, %v37_v18   ;;  %v24_v51 = vld [vmem:[%s400_s3] sm:$0x3]  ;;  %s321_s3 = scalar_lea.vmem %s298_s27, 256  ;;  %p326_p1 = scmp.lt.s32.totalorder %s298_s27, %s298_s27 }
   0x7   :  { %v57_v11 = vrot.slane %v43_v0, %v56_v10  ;;  %v64_v12 = vrot.slane %v50_v8, %v56_v10  ;;  %34 = vperm.xlu0 %317, %v26_v9   ;;  %p322_p0 = scmp.ne.s32.totalorder %s298_s27, %s321_s3  ;;  %p327_p2 = scmp.lt.s32.totalorder %s321_s3, %s321_s3 }
   0x9   :  { %v65_v13 = vcombine.high %v57_v11, %v57_v11  ;;  %v66_v14 = vcombine.high %v64_v12, %v64_v12  ;;  %v73_v15 = vsel %vm71_vm0, %v57_v11, 0  ;;  %v79_v16 = vsel %vm71_vm0, %v64_v12, 0  ;;  %p328_p3 = por %p327_p2, %p326_p1 }
   0xb   :  { %306 = vmatprep.subr.msk.bf16.mxu0 %vm71_vm0, %v65_v13  ;;  %308 = vmatprep.subr.msk.bf16.mxu1 %vm71_vm0, %v66_v14  ;;  %p329_p4 = pnand %p328_p3, %p322_p0 }
   0xc   :  { %99 = vmatpush1.bf16.msra.mxu0 %v73_v15  ;;  %142 = vmatpush1.bf16.msra.mxu1 %v79_v16 }
   0xf   :  { %307 = vmatmul.mubr.msk.bf16.vlgmr.msra.gmra.mxu0 %vm67_vm1, %v320_v17  ;;  %309 = vmatmul.mubr.msk.bf16.vlgmr.msra.gmra.mxu1 %vm67_vm1, %v320_v17 }
  0x10   :  { %231 = vmatprep.mubr.bf16.mxu0 %v344_v5  ;;  %272 = vmatprep.mubr.bf16.mxu1 %v344_v5 }
  0x7e   :  { %v30_v19 = vpop.permute.xlu0 %29 }
  0x81   :  { %v41_v52 = vpop.permute.xlu1 %40 }
  0x82   :  { %v35_v26 = vpop.permute.xlu0 %34 }
  0xcf   :  { %v118_v20 = vpop.f32.mrf.mxu0  ;;  %v161_v21 = vpop.f32.mrf.mxu1 }
  0xd0   :  { %v119_v22 = vadd.f32 %v118_v20, %v30_v19  ;;  %v162_v23 = vadd.f32 %v161_v21, %v30_v19 }
  0xd1   :  { %v120_v24 = vpop.f32.mrf.mxu0  ;;  %v163_v25 = vpop.f32.mrf.mxu1 }
  0xd2   :  { %v121_v27 = vadd.f32 %v120_v24, %v30_v19  ;;  %v164_v28 = vadd.f32 %v163_v25, %v30_v19  ;;  %v170_v33 = vmax.f32 %v119_v22, 0.0  ;;  %v172_v34 = vmax.f32 %v162_v23, 0.0 }
  0xd3   :  { %v122_v29 = vpop.f32.mrf.mxu0  ;;  %v165_v30 = vpop.f32.mrf.mxu1 }
  0xd4   :  { %v123_v31 = vadd.f32 %v122_v29, %v35_v26  ;;  %v166_v32 = vadd.f32 %v165_v30, %v35_v26  ;;  %v171_v41 = vmax.f32 %v121_v27, 0.0  ;;  %v173_v42 = vmax.f32 %v164_v28, 0.0 }
  0xd5   :  { %v124_v35 = vpop.f32.mrf.mxu0  ;;  %v167_v36 = vpop.f32.mrf.mxu1 }
  0xd6   :  { %v174_v37 = vmax.f32 %v123_v31, 0.0  ;;  %v176_v38 = vmax.f32 %v166_v32, 0.0  ;;  %v125_v39 = vadd.f32 %v124_v35, %v35_v26  ;;  %v168_v40 = vadd.f32 %v167_v36, %v35_v26 }
  0xd8   :  { %v178_v43 = vpack.c.bf16 %v174_v37, %v170_v33  ;;  %v180_v44 = vpack.c.bf16 %v176_v38, %v172_v34  ;;  %v175_v45 = vmax.f32 %v125_v39, 0.0  ;;  %v177_v46 = vmax.f32 %v168_v40, 0.0 }
  0xda   :  { %v179_v47 = vpack.c.bf16 %v175_v45, %v171_v41  ;;  %v181_v48 = vpack.c.bf16 %v177_v46, %v173_v42  ;;  %v188_v49 = vsel %vm186_vm2, %v178_v43, 0  ;;  %v194_v50 = vsel %vm186_vm2, %v180_v44, 0 }
  0xdc   :  { %310 = vmatprep.subr.msk.bf16.mxu0 %vm186_vm2, %v179_v47  ;;  %312 = vmatprep.subr.msk.bf16.mxu1 %vm186_vm2, %v181_v48 }
  0xdd   :  { %214 = vmatpush1.bf16.msra.mxu0 %v188_v49  ;;  %255 = vmatpush1.bf16.msra.mxu1 %v194_v50 }
  0xe0   :  { %311 = vmatmul.mubr.msk.bf16.vlgmr.msra.gmra.mxu0 %vm182_vm3, %v24_v51  ;;  %313 = vmatmul.mubr.msk.bf16.vlgmr.msra.gmra.mxu1 %vm182_vm3, %v24_v51 }
 0x1a0   :  { %v233_v53 = vpop.f32.mrf.mxu0  ;;  %v274_v54 = vpop.f32.mrf.mxu1 }
 0x1a1   :  { %v234_v57 = vadd.f32 %v233_v53, %v41_v52  ;;  %v275_v59 = vadd.f32 %v274_v54, %v41_v52 }
 0x1a2   :  { %v235_v55 = vpop.f32.mrf.mxu0  ;;  %v276_v56 = vpop.f32.mrf.mxu1 }
 0x1a3   :  { %v236_v58 = vadd.f32 %v235_v55, %v41_v52  ;;  %v277_v60 = vadd.f32 %v276_v56, %v41_v52 }
 0x1a4   :  { %v237_v61 = vpop.f32.mrf.mxu0  ;;  %v278_v62 = vpop.f32.mrf.mxu1 }
 0x1a5   :  { %v285_v63 = vcombine.low %v234_v57, %v236_v58  ;;  %v286_v0 = vcombine.low %v275_v59, %v277_v60 }
 0x1a6   :  { %v238_v1 = vpop.f32.mrf.mxu0  ;;  %v279_v2 = vpop.f32.mrf.mxu1 }
 0x1a7   :  { %289 = vst [vmem:[#allocation2] sm:$0x77] %v285_v63  ;;  %290 = vst [vmem:[#allocation2 + $0x8] sm:$0x77] %v286_v0 }
 0x1a8   :  { %332 = shalt.err (!%p329_p4)
}
 0x1a9   :  { %300 = dma.vmem_to_hbm [thread:$0]  %s298_s27, 256, %s402_s5, [#allocation3]  }
 0x1aa   :  { %341 = dma.done.wait [#allocation3], 256  }
 0x1ab   :  { %342 = vsyncadd [#allocation3], 4294967040 }
 0x1ac   :  { %304 = vsyncpa [#allocation3], 1 }

</bundles_post_ra>
